<compile_context>
chip_gen: v6e
topology: v6e:2x2x1
jax: 0.10.0
libtpu: 0.0.40
codegen_flags: <defaults>
</compile_context>

<pallas_src>
import jax
import jax.numpy as jnp
from jax.experimental import pallas as pl
from jax.experimental.pallas import tpu as pltpu


_BIG = 3.0e38   # finite "infinity" sentinel (avoids inf arithmetic in the carry)
_CHUNK = 128    # sublane-chunk for the fused min/argmin pass


def _round_up(x, m):
    return ((x + m - 1) // m) * m


# ----------------------------------------------------------------------------
# Kernel 1: batched k=1 KNN (nearest same-batch dino point for every point)
# ----------------------------------------------------------------------------
def _knn1_kernel(qlo_ref, qhi_ref, dlo_ref, dhi_ref,       # SMEM scalar prefetch
                 qt_ref, d_ref, qb_ref, db_ref,             # VMEM inputs
                 idx_ref,                                    # output (resident)
                 best_ref):                                  # VMEM scratch
    # qt_ref : [8,  TN] f32   query rows [-2x,-2y,-2z, 1, 0..] transposed
    # d_ref  : [TM, 8 ] f32   data rows  [ x,  y,  z, |x|^2, 0..]
    # qb_ref : [1,  TN] i32   batch id per query (-2 on padding lanes)
    # db_ref : [TM, 1 ] i32   batch id per data point (-1 on padding rows)
    # idx_ref: [1,  TN] i32   running argmin (output, resident across data axis)
    # best_ref:[1,  TN] f32   running min "distance"
    i = pl.program_id(0)
    k = pl.program_id(1)
    tm = d_ref.shape[0]

    @pl.when(k == 0)
    def _init():
        best_ref[...] = jnp.full_like(best_ref, _BIG)
        idx_ref[...] = jnp.zeros_like(idx_ref)

    # Batches are contiguous -> skip (query-tile, data-tile) pairs whose batch
    # ranges do not overlap (pure cross-batch work).
    overlap = jnp.logical_and(qlo_ref[i] <= dhi_ref[k], dlo_ref[k] <= qhi_ref[i])

    @pl.when(overlap)
    def _compute():
        qt = qt_ref[...]                                     # [8, TN]
        qb = qb_ref[...]                                     # [1, TN]
        base = k * tm
        # column iota generated once per grid step, [CHUNK,1] (broadcast in where)
        row_iota = jax.lax.broadcasted_iota(jnp.int32, (_CHUNK, 1), 0)

        for c in range(tm // _CHUNK):                        # static, short
            lo = c * _CHUNK
            d_chunk = d_ref[pl.ds(lo, _CHUNK), :]            # [CHUNK, 8]
            db_chunk = db_ref[pl.ds(lo, _CHUNK), :]          # [CHUNK, 1]

            # argmin_x ||y - x||^2 == argmin_x (||x||^2 - 2 x.y): the per-query
            # ||y||^2 term is argmin-invariant and the remaining expression
            # falls straight out of the MXU (norms folded into the contraction).
            dist = jnp.dot(d_chunk, qt,
                           preferred_element_type=jnp.float32)    # [CHUNK, TN]
            dist = jnp.where(db_chunk == qb, dist, _BIG)

            cur_min = jnp.min(dist, axis=0, keepdims=True)        # [1, TN]
            cur_arg = jnp.min(jnp.where(dist == cur_min, row_iota, _CHUNK),
                              axis=0, keepdims=True) + (base + lo)

            # Strict '<': a fully-masked (wrong-batch / padded) chunk never
            # overrides the running best.
            better = cur_min < best_ref[...]                      # [1, TN]
            idx_ref[...] = jnp.where(better, cur_arg, idx_ref[...])
            best_ref[...] = jnp.where(better, cur_min, best_ref[...])


def knn1_pallas(query_coord, data_coord, query_batch, data_batch,
                *, tile_q=512, tile_d=1024):
    n = query_coord.shape[0]
    m = data_coord.shape[0]

    # Query tile: prefer >=2 blocks along the parallel axis (v7x megacore).
    n128 = _round_up(n, 128)
    tn = min(tile_q, n128)
    if n128 <= tn and n128 >= 256:
        tn = _round_up(n128 // 2, 128)
    tm = min(tile_d, _round_up(m, 128))
    n_pad = _round_up(n, tn)
    m_pad = _round_up(m, tm)
    n_blocks = n_pad // tn
    m_blocks = m_pad // tm

    # Mean-center coordinates (same shift for both sides) so the expanded-form
    # distance does not suffer catastrophic cancellation in f32.
    shift = jnp.mean(data_coord.astype(jnp.float32), axis=0, keepdims=True)
    q = query_coord.astype(jnp.float32) - shift
    d = data_coord.astype(jnp.float32) - shift

    # Fold the squared norm into the contraction:
    #   data rows  = [ x, y, z, ||x||^2, 0,0,0,0 ]
    #   query rows = [-2x,-2y,-2z, 1,     0,0,0,0 ]   (transposed to [8, n_pad])
    d8 = jnp.pad(jnp.concatenate([d, jnp.sum(d * d, axis=1, keepdims=True)], 1),
                 ((0, m_pad - m), (0, 4)))                       # [m_pad, 8]
    qt = jnp.pad(jnp.concatenate([-2.0 * q, jnp.ones((n, 1), jnp.float32)], 1),
                 ((0, n_pad - n), (0, 4))).T                     # [8, n_pad]

    qb = jnp.pad(query_batch.astype(jnp.int32), (0, n_pad - n),
                 constant_values=-2).reshape(1, n_pad)
    db = jnp.pad(data_batch.astype(jnp.int32), (0, m_pad - m),
                 constant_values=-1).reshape(m_pad, 1)

    # Per-tile batch ranges (edge-padded so padding does not widen the range);
    # scalar-prefetched into SMEM and used to skip cross-batch tile pairs.
    qb_rng = jnp.pad(query_batch.astype(jnp.int32), (0, n_pad - n), mode="edge")
    db_rng = jnp.pad(data_batch.astype(jnp.int32), (0, m_pad - m), mode="edge")
    q_lo = qb_rng.reshape(n_blocks, tn).min(axis=1)
    q_hi = qb_rng.reshape(n_blocks, tn).max(axis=1)
    d_lo = db_rng.reshape(m_blocks, tm).min(axis=1)
    d_hi = db_rng.reshape(m_blocks, tm).max(axis=1)

    grid_spec = pltpu.PrefetchScalarGridSpec(
        num_scalar_prefetch=4,
        grid=(n_blocks, m_blocks),
        in_specs=[
            pl.BlockSpec((8, tn), lambda i, k, ql, qh, dl, dh: (0, i)),   # q^T
            pl.BlockSpec((tm, 8), lambda i, k, ql, qh, dl, dh: (k, 0)),   # dino
            pl.BlockSpec((1, tn), lambda i, k, ql, qh, dl, dh: (0, i)),   # q batch
            pl.BlockSpec((tm, 1), lambda i, k, ql, qh, dl, dh: (k, 0)),   # d batch
        ],
        out_specs=pl.BlockSpec((1, tn), lambda i, k, ql, qh, dl, dh: (0, i)),
        scratch_shapes=[pltpu.VMEM((1, tn), jnp.float32)],
    )

    idx = pl.pallas_call(
        _knn1_kernel,
        out_shape=jax.ShapeDtypeStruct((1, n_pad), jnp.int32),
        grid_spec=grid_spec,
        compiler_params=pltpu.CompilerParams(
            dimension_semantics=("parallel", "arbitrary")),
    )(q_lo, q_hi, d_lo, d_hi, qt, d8, qb, db)

    return idx.reshape(-1)[:n]


# ----------------------------------------------------------------------------
# Kernel 2: fused (gathered) concat + seg_head linear
#   seg_logits = point_feat @ W_top + dino_feat[idx] @ W_bot + b
# ----------------------------------------------------------------------------
def _seg_head_kernel(pf_ref, df_ref, w1_ref, w2_ref, b_ref, out_ref):
    # pf_ref:[TN,Cb]f32  df_ref:[TN,Cd]f32  w1:[Cb,K]bf16  w2:[Cd,K]bf16
    # b_ref:[1,K]f32     out_ref:[TN,K]f32
    pf = pf_ref[...].astype(jnp.bfloat16)     # cast under the DMA (cheap filler)
    df = df_ref[...].astype(jnp.bfloat16)
    acc = jnp.dot(pf, w1_ref[...], preferred_element_type=jnp.float32)
    acc = acc + jnp.dot(df, w2_ref[...], preferred_element_type=jnp.float32)
    out_ref[...] = acc + b_ref[...]


def seg_head_pallas(point_feat, dino_feat_gathered, weight_t, bias,
                    *, tile_n=2048):
    n, cb = point_feat.shape
    cd = dino_feat_gathered.shape[1]
    k = weight_t.shape[1]

    # Un-padded N (partial last block) and un-padded class dim: no host-side
    # pad/cast copies and no HBM write amplification on the class axis.
    if n <= tile_n:
        tn = n if n < 1024 else _round_up((n + 1) // 2, 8)   # >=2 blocks on v7x
    else:
        tn = tile_n
    grid = (pl.cdiv(n, tn),)

    w1 = weight_t[:cb].astype(jnp.bfloat16)
    w2 = weight_t[cb:].astype(jnp.bfloat16)
    b = bias.astype(jnp.float32).reshape(1, k)

    cost = pl.CostEstimate(
        flops=2 * n * (cb + cd) * k,
        transcendentals=0,
        bytes_accessed=n * (cb + cd) * 4 + n * k * 4 + (cb + cd) * k * 2 + k * 4,
    )

    out = pl.pallas_call(
        _seg_head_kernel,
        out_shape=jax.ShapeDtypeStruct((n, k), jnp.float32),
        grid=grid,
        in_specs=[
            pl.BlockSpec((tn, cb), lambda i: (i, 0)),      # streamed f32 feats
            pl.BlockSpec((tn, cd), lambda i: (i, 0)),      # streamed f32 feats
            pl.BlockSpec((cb, k), lambda i: (0, 0)),       # resident weights
            pl.BlockSpec((cd, k), lambda i: (0, 0)),
            pl.BlockSpec((1, k), lambda i: (0, 0)),        # resident bias
        ],
        out_specs=pl.BlockSpec((tn, k), lambda i: (i, 0)),
        compiler_params=pltpu.CompilerParams(
            dimension_semantics=("parallel",)),
        cost_estimate=cost,
    )(point_feat.astype(jnp.float32),
      dino_feat_gathered.astype(jnp.float32), w1, w2, b)
    return out


# ----------------------------------------------------------------------------
# Glue: offset -> batch ids (pointcept's offset2batch)
# ----------------------------------------------------------------------------
def offset2batch(offset, n):
    # offset: cumulative sizes, e.g. [32, 64] -> batch ids [0]*32 + [1]*32
    return jnp.searchsorted(offset.astype(jnp.int32),
                            jnp.arange(n, dtype=jnp.int32),
                            side="right").astype(jnp.int32)


# ----------------------------------------------------------------------------
# Model wrapper (eval path of DINOEnhancedSegmentor.forward)
# ----------------------------------------------------------------------------
def dino_enhanced_segmentor_forward(input_dict, params):
    point_feat = input_dict["point_feat"]          # [N, Cb]  (backbone output)
    origin_coord = input_dict["origin_coord"]      # [N, 3]
    origin_offset = input_dict["origin_offset"]    # [B]
    dino_coord = input_dict["dino_coord"]          # [M, 3]
    dino_feat = input_dict["dino_feat"]            # [M, Cd]
    dino_offset = input_dict["dino_offset"]        # [B]

    n = origin_coord.shape[0]
    m = dino_coord.shape[0]

    batch_y = offset2batch(origin_offset, n)
    batch_x = offset2batch(dino_offset, m)

    # k=1 KNN: nearest same-batch dino point for every backbone point.
    idx = knn1_pallas(origin_coord, dino_coord, batch_y, batch_x)       # [N]

    # Row gather (XLA), then fused split-matmul head (no concat tensor in HBM).
    dino_gathered = jnp.take(dino_feat, idx, axis=0)                    # [N,Cd]
    seg_logits = seg_head_pallas(point_feat, dino_gathered,
                                 params["seg_head_w_t"], params["seg_head_b"])
    return {"seg_logits": seg_logits}


if __name__ == "__main__":
    key = jax.random.PRNGKey(0)
    k0, k1, k2, k3, k4, k5 = jax.random.split(key, 6)

    B = 2              # batches
    N = 64             # backbone points (32 per batch)
    M = 128            # dino points (64 per batch)
    Cb = 16            # backbone feature channels
    Cd = 32            # dino feature channels
    num_classes = 8
    backbone_out_channels = Cb + Cd   # seg_head input dim (post-concat)

    input_dict = {
        "origin_coord": jax.random.uniform(k0, (N, 3), jnp.float32),
        "origin_offset": jnp.array([N // 2, N], dtype=jnp.int32),
        "point_feat": jax.random.normal(k1, (N, Cb), jnp.float32),
        "dino_coord": jax.random.uniform(k2, (M, 3), jnp.float32),
        "dino_feat": jax.random.normal(k3, (M, Cd), jnp.float32),
        "dino_offset": jnp.array([M // 2, M], dtype=jnp.int32),
    }

    # Deterministic nn.Linear-style parameters (weight stored transposed [C, K]).
    bound = 1.0 / jnp.sqrt(float(backbone_out_channels))
    params = {
        "seg_head_w_t": jax.random.uniform(
            k4, (backbone_out_channels, num_classes), jnp.float32,
            minval=-bound, maxval=bound),
        "seg_head_b": jax.random.uniform(
            k5, (num_classes,), jnp.float32, minval=-bound, maxval=bound),
    }

    out = dino_enhanced_segmentor_forward(input_dict, params)
    seg_logits = jax.block_until_ready(out["seg_logits"])
    assert seg_logits.shape == (N, num_classes)
    assert bool(jnp.all(jnp.isfinite(seg_logits)))

    # --- correctness checks against a pure-JAX reference -------------------
    batch_y = offset2batch(input_dict["origin_offset"], N)
    batch_x = offset2batch(input_dict["dino_offset"], M)
    idx = jax.block_until_ready(
        knn1_pallas(input_dict["origin_coord"], input_dict["dino_coord"],
                    batch_y, batch_x))

    # 1) chosen neighbor is in the same batch and (numerically) the nearest.
    assert bool(jnp.all(batch_x[idx] == batch_y))
    diff = input_dict["origin_coord"][:, None, :] - input_dict["dino_coord"][None, :, :]
    d2 = jnp.sum(diff * diff, axis=-1)
    d2 = jnp.where(batch_y[:, None] == batch_x[None, :], d2, jnp.inf)
    best = jnp.min(d2, axis=1)
    chosen = d2[jnp.arange(N), idx]
    assert bool(jnp.all(chosen <= best + 1e-4))

    # 2) fused seg head matches concat + dense reference (bf16 MXU tolerance).
    feat_ref = jnp.concatenate(
        [input_dict["point_feat"], input_dict["dino_feat"][idx]], axis=-1)
    logits_ref = feat_ref @ params["seg_head_w_t"] + params["seg_head_b"]
    assert bool(jnp.allclose(seg_logits, logits_ref, atol=5e-2, rtol=5e-2))

    print("KERNEL_OK")
</pallas_src>

<mosaic_0001>
module attributes {stable_mosaic.version = 11 : i64} {
  func.func @_knn1_kernel(%arg0: i32, %arg1: i32, %arg2: memref<1xi32, #tpu.memory_space<smem>>, %arg3: memref<1xi32, #tpu.memory_space<smem>>, %arg4: memref<1xi32, #tpu.memory_space<smem>>, %arg5: memref<1xi32, #tpu.memory_space<smem>>, %arg6: memref<8x128xf32, #tpu.memory_space<vmem>>, %arg7: memref<128x8xf32, #tpu.memory_space<vmem>>, %arg8: memref<1x128xi32, #tpu.memory_space<vmem>>, %arg9: memref<128x1xi32, #tpu.memory_space<vmem>>, %arg10: memref<1x128xi32, #tpu.memory_space<vmem>>, %arg11: memref<1x128xf32, #tpu.memory_space<vmem>>) attributes {dimension_semantics = [#tpu.dimension_semantics<parallel>, #tpu.dimension_semantics<arbitrary>], iteration_bounds = array<i64: 1, 1>, scalar_prefetch = 4 : i64, scratch_operands = 1 : i64, tpu.core_type = #tpu.core_type<tc>, window_params = [{transform_indices = @transform_0, window_bounds = array<i64: 8, 128>}, {transform_indices = @transform_1, window_bounds = array<i64: 128, 8>}, {transform_indices = @transform_2, window_bounds = array<i64: 1, 128>}, {transform_indices = @transform_3, window_bounds = array<i64: 128, 1>}, {transform_indices = @transform_4, window_bounds = array<i64: 1, 128>}]} {
    %c0_i32 = arith.constant 0 : i32
    %0 = arith.cmpi eq, %arg1, %c0_i32 : i32
    %1 = arith.extui %0 : i1 to i32
    %c0_i32_0 = arith.constant 0 : i32
    %2 = arith.cmpi ne, %1, %c0_i32_0 : i32
    scf.if %2 {
      %cst = arith.constant 3.000000e+38 : f32
      %16 = vector.broadcast %cst : f32 to vector<1x128xf32>
      %c0 = arith.constant 0 : index
      %c0_2 = arith.constant 0 : index
      %17 = vector.load %arg11[%c0, %c0_2] : memref<1x128xf32, #tpu.memory_space<vmem>>, vector<1x128xf32>
      tpu.vector_store %arg11[%c0, %c0_2], %16 {strides = array<i32>} : memref<1x128xf32, #tpu.memory_space<vmem>>, vector<1x128xf32>,
      %c0_i32_3 = arith.constant 0 : i32
      %18 = vector.broadcast %c0_i32_3 : i32 to vector<1x128xi32>
      %c0_4 = arith.constant 0 : index
      %c0_5 = arith.constant 0 : index
      %19 = vector.load %arg10[%c0_4, %c0_5] : memref<1x128xi32, #tpu.memory_space<vmem>>, vector<1x128xi32>
      tpu.vector_store %arg10[%c0_4, %c0_5], %18 {strides = array<i32>} : memref<1x128xi32, #tpu.memory_space<vmem>>, vector<1x128xi32>,
    } else {
    }
    %3 = arith.index_cast %arg0 : i32 to index
    %4 = memref.load %arg2[%3] : memref<1xi32, #tpu.memory_space<smem>>
    %5 = arith.index_cast %arg1 : i32 to index
    %6 = memref.load %arg5[%5] : memref<1xi32, #tpu.memory_space<smem>>
    %7 = arith.cmpi sle, %4, %6 : i32
    %8 = arith.index_cast %arg1 : i32 to index
    %9 = memref.load %arg4[%8] : memref<1xi32, #tpu.memory_space<smem>>
    %10 = arith.index_cast %arg0 : i32 to index
    %11 = memref.load %arg3[%10] : memref<1xi32, #tpu.memory_space<smem>>
    %12 = arith.cmpi sle, %9, %11 : i32
    %13 = arith.andi %7, %12 : i1
    %14 = arith.extui %13 : i1 to i32
    %c0_i32_1 = arith.constant 0 : i32
    %15 = arith.cmpi ne, %14, %c0_i32_1 : i32
    scf.if %15 {
      %c0 = arith.constant 0 : index
      %c0_2 = arith.constant 0 : index
      %16 = vector.load %arg6[%c0, %c0_2] : memref<8x128xf32, #tpu.memory_space<vmem>>, vector<8x128xf32>
      %c0_3 = arith.constant 0 : index
      %c0_4 = arith.constant 0 : index
      %17 = vector.load %arg8[%c0_3, %c0_4] : memref<1x128xi32, #tpu.memory_space<vmem>>, vector<1x128xi32>
      %c128_i32 = arith.constant 128 : i32
      %18 = arith.muli %arg1, %c128_i32 : i32
      %19 = tpu.iota {dimensions = array<i32: 0>} : vector<128x1xi32>
      %c0_5 = arith.constant 0 : index
      %c0_6 = arith.constant 0 : index
      %20 = vector.load %arg7[%c0_5, %c0_6] : memref<128x8xf32, #tpu.memory_space<vmem>>, vector<128x8xf32>
      %c0_7 = arith.constant 0 : index
      %c0_8 = arith.constant 0 : index
      %21 = vector.load %arg9[%c0_7, %c0_8] : memref<128x1xi32, #tpu.memory_space<vmem>>, vector<128x1xi32>
      %cst = arith.constant dense<0.000000e+00> : vector<128x128xf32>
      %22 = tpu.matmul %20, %16, %cst {dimension_numbers = #tpu.dot_dimension_numbers<[1], [0], [0], [1], [0, 0, 1, 1], [], []>} : vector<128x8xf32>, vector<8x128xf32>, vector<128x128xf32> -> vector<128x128xf32>
      %23 = vector.broadcast %21 : vector<128x1xi32> to vector<128x128xi32>
      %24 = vector.broadcast %17 : vector<1x128xi32> to vector<128x128xi32>
      %25 = arith.cmpi eq, %23, %24 : vector<128x128xi32>
      %cst_9 = arith.constant 3.000000e+38 : f32
      %26 = vector.broadcast %cst_9 : f32 to vector<128x128xf32>
      %27 = arith.select %25, %22, %26 : vector<128x128xi1>, vector<128x128xf32>
      %cst_10 = arith.constant dense<0x7F800000> : vector<128xf32>
      %28 = vector.multi_reduction <minimumf>, %27, %cst_10 [0] : vector<128x128xf32> to vector<128xf32>
      %29 = vector.shape_cast %28 : vector<128xf32> to vector<1x128xf32>
      %30 = vector.broadcast %29 : vector<1x128xf32> to vector<128x128xf32>
      %31 = arith.cmpf oeq, %27, %30 : vector<128x128xf32>
      %c128_i32_11 = arith.constant 128 : i32
      %32 = vector.shape_cast %19 : vector<128x1xi32> to vector<128x1xi32>
      %33 = vector.broadcast %32 : vector<128x1xi32> to vector<128x128xi32>
      %34 = vector.broadcast %c128_i32_11 : i32 to vector<128x128xi32>
      %35 = arith.select %31, %33, %34 : vector<128x128xi1>, vector<128x128xi32>
      %cst_12 = arith.constant dense<2147483647> : vector<128xi32>
      %36 = vector.multi_reduction <minsi>, %35, %cst_12 [0] : vector<128x128xi32> to vector<128xi32>
      %37 = vector.shape_cast %36 : vector<128xi32> to vector<1x128xi32>
      %c0_i32_13 = arith.constant 0 : i32
      %38 = arith.addi %18, %c0_i32_13 : i32
      %39 = vector.broadcast %38 : i32 to vector<1x128xi32>
      %40 = arith.addi %37, %39 : vector<1x128xi32>
      %c0_14 = arith.constant 0 : index
      %c0_15 = arith.constant 0 : index
      %41 = vector.load %arg11[%c0_14, %c0_15] : memref<1x128xf32, #tpu.memory_space<vmem>>, vector<1x128xf32>
      %42 = arith.cmpf olt, %29, %41 : vector<1x128xf32>
      %c0_16 = arith.constant 0 : index
      %c0_17 = arith.constant 0 : index
      %43 = vector.load %arg10[%c0_16, %c0_17] : memref<1x128xi32, #tpu.memory_space<vmem>>, vector<1x128xi32>
      %44 = arith.select %42, %40, %43 : vector<1x128xi1>, vector<1x128xi32>
      %c0_18 = arith.constant 0 : index
      %c0_19 = arith.constant 0 : index
      %45 = vector.load %arg10[%c0_18, %c0_19] : memref<1x128xi32, #tpu.memory_space<vmem>>, vector<1x128xi32>
      tpu.vector_store %arg10[%c0_18, %c0_19], %44 {strides = array<i32>} : memref<1x128xi32, #tpu.memory_space<vmem>>, vector<1x128xi32>,
      %c0_20 = arith.constant 0 : index
      %c0_21 = arith.constant 0 : index
      %46 = vector.load %arg11[%c0_20, %c0_21] : memref<1x128xf32, #tpu.memory_space<vmem>>, vector<1x128xf32>
      %47 = arith.select %42, %29, %46 : vector<1x128xi1>, vector<1x128xf32>
      %c0_22 = arith.constant 0 : index
      %c0_23 = arith.constant 0 : index
      %48 = vector.load %arg11[%c0_22, %c0_23] : memref<1x128xf32, #tpu.memory_space<vmem>>, vector<1x128xf32>
      tpu.vector_store %arg11[%c0_22, %c0_23], %47 {strides = array<i32>} : memref<1x128xf32, #tpu.memory_space<vmem>>, vector<1x128xf32>,
    } else {
    }
    return
  }
  func.func @transform_0(%arg0: i32, %arg1: i32, %arg2: memref<1xi32, #tpu.memory_space<smem>>, %arg3: memref<1xi32, #tpu.memory_space<smem>>, %arg4: memref<1xi32, #tpu.memory_space<smem>>, %arg5: memref<1xi32, #tpu.memory_space<smem>>) -> (i32, i32) {
    %c0_i32 = arith.constant 0 : i32
    %c0_i32_0 = arith.constant 0 : i32
    return %c0_i32, %arg0 : i32, i32
  }
  func.func @transform_1(%arg0: i32, %arg1: i32, %arg2: memref<1xi32, #tpu.memory_space<smem>>, %arg3: memref<1xi32, #tpu.memory_space<smem>>, %arg4: memref<1xi32, #tpu.memory_space<smem>>, %arg5: memref<1xi32, #tpu.memory_space<smem>>) -> (i32, i32) {
    %c0_i32 = arith.constant 0 : i32
    %c0_i32_0 = arith.constant 0 : i32
    return %arg1, %c0_i32 : i32, i32
  }
  func.func @transform_2(%arg0: i32, %arg1: i32, %arg2: memref<1xi32, #tpu.memory_space<smem>>, %arg3: memref<1xi32, #tpu.memory_space<smem>>, %arg4: memref<1xi32, #tpu.memory_space<smem>>, %arg5: memref<1xi32, #tpu.memory_space<smem>>) -> (i32, i32) {
    %c0_i32 = arith.constant 0 : i32
    %c0_i32_0 = arith.constant 0 : i32
    return %c0_i32, %arg0 : i32, i32
  }
  func.func @transform_3(%arg0: i32, %arg1: i32, %arg2: memref<1xi32, #tpu.memory_space<smem>>, %arg3: memref<1xi32, #tpu.memory_space<smem>>, %arg4: memref<1xi32, #tpu.memory_space<smem>>, %arg5: memref<1xi32, #tpu.memory_space<smem>>) -> (i32, i32) {
    %c0_i32 = arith.constant 0 : i32
    %c0_i32_0 = arith.constant 0 : i32
    return %arg1, %c0_i32 : i32, i32
  }
  func.func @transform_4(%arg0: i32, %arg1: i32, %arg2: memref<1xi32, #tpu.memory_space<smem>>, %arg3: memref<1xi32, #tpu.memory_space<smem>>, %arg4: memref<1xi32, #tpu.memory_space<smem>>, %arg5: memref<1xi32, #tpu.memory_space<smem>>) -> (i32, i32) {
    %c0_i32 = arith.constant 0 : i32
    %c0_i32_0 = arith.constant 0 : i32
    return %c0_i32, %arg0 : i32, i32
  }
}

</mosaic_0001>

<bundles_post_ra>
// kernel: tpu_custom_call.1
= control target key start
LH: loop header
LB: loop body
LE: loop exit
PB: predicated region body
PF: predicated region fallthrough
CT: control target
= control target key end

     0   :  { %17 = vsyncpa [#allocation9], 0  ;;  %v578_v0 = vmov 3e+38   ;;  %v579_v1 = vmov 0   ;;  %s889_s0 = inlined_call_operand.<no memory space> [shape: s32[1], index: 0, kind: input, shape index: {}]   ;;  %s890_s1 = inlined_call_operand.<no memory space> [shape: s32[1], index: 1, kind: input, shape index: {}]   ;;  %s891_s2 = inlined_call_operand.<no memory space> [shape: s32[1], index: 2, kind: input, shape index: {}]   ;;  %s892_s3 = inlined_call_operand.<no memory space> [shape: s32[1], index: 3, kind: input, shape index: {}]   ;;  %s893_s4 = inlined_call_operand.vmem [shape: f32[8,128], index: 4, kind: input, shape index: {}]   ;;  %s894_s5 = inlined_call_operand.vmem [shape: f32[128,8], index: 5, kind: input, shape index: {}]   ;;  %s895_s6 = inlined_call_operand.vmem [shape: s32[1,128], index: 6, kind: input, shape index: {}]   ;;  %s896_s7 = inlined_call_operand.vmem [shape: s32[128,1], index: 7, kind: input, shape index: {}]   ;;  %s897_s8 = inlined_call_operand.hbm [shape: s32[1,128], index: 8, kind: output, shape index: {}]  }
   0x1   :  { %p34_p0 = scmp.le.s32.totalorder %s889_s0, %s892_s3  ;;  %p37_p1 = scmp.le.s32.totalorder %s891_s2, %s890_s1  ;;  %30 = vst [vmem:[#allocation2] sm:$0x1] %v578_v0  ;;  %31 = vst [vmem:[#allocation8] sm:$0x1] %v579_v1 }
   0x3   :  { %p38_p2 = pnand %p37_p1, %p34_p0 }
   0x5   :  { %41 = sbr.rel (%p38_p2) target bundleno = 276 (0x114), region = 25 }
   0xa   :  { %v42_v2 = vld [vmem:[%s893_s4] sm:$0xff]  ;;  %vm94_vm0 = vcmask 64512   ;;  %v63_v5 = vld [vmem:[%s894_s5 + $0x8] sm:$0xff]  ;;  %v64_v7 = vld [vmem:[%s894_s5 + $0x10] sm:$0xff]  ;;  %v580_v14 = vmov 0  }
   0xb   :  { %v62_v3 = vld [vmem:[%s894_s5] sm:$0xff]  ;;  %522 = vmatprep.subr.mxu0 %v42_v2  ;;  %548 = vmatprep.subr.mxu1 %v42_v2  ;;  %v71_v6 = vld [vmem:[%s894_s5 + $0x48] sm:$0xff]  ;;  %v72_v8 = vld [vmem:[%s894_s5 + $0x50] sm:$0xff] }
   0xc   :  { %v70_v4 = vld [vmem:[%s894_s5 + $0x40] sm:$0xff]  ;;  %523 = vmatpush3.msra.mxu0 %v42_v2  ;;  %549 = vmatpush3.msra.mxu1 %v42_v2  ;;  %v65_v9 = vld [vmem:[%s894_s5 + $0x18] sm:$0xff]  ;;  %v80_v11 = vld [vmem:[%s896_s7 + $0x10] sm:$0xff] }
   0xd   :  { %524 = vmatprep.mubr.msk.f32.mxu0 %vm94_vm0, %v62_v3  ;;  %536 = vmatprep.mubr.msk.f32.mxu1 %vm94_vm0, %v70_v4  ;;  %v73_v10 = vld [vmem:[%s894_s5 + $0x58] sm:$0xff]  ;;  %v66_v12 = vld [vmem:[%s894_s5 + $0x20] sm:$0xff]  ;;  %v79_v17 = vld [vmem:[%s896_s7 + $0x8] sm:$0xff] }
   0xe   :  { %525 = vmatmul.mubr.msk.f32.vlgmr.msra.gmra.mxu0 %vm94_vm0, %v63_v5  ;;  %537 = vmatmul.mubr.msk.f32.vlgmr.msra.gmra.mxu1 %vm94_vm0, %v71_v6  ;;  %v74_v13 = vld [vmem:[%s894_s5 + $0x60] sm:$0xff]  ;;  %v81_v16 = vld [vmem:[%s896_s7 + $0x18] sm:$0xff]  ;;  %v67_v18 = vld [vmem:[%s894_s5 + $0x28] sm:$0xff] }
   0xf   :  { %527 = vmatprep.mubr.msk.f32.mxu0 %vm94_vm0, %v64_v7  ;;  %539 = vmatprep.mubr.msk.f32.mxu1 %vm94_vm0, %v72_v8  ;;  %v78_v15 = vld [vmem:[%s896_s7] sm:$0xff]  ;;  %v75_v19 = vld [vmem:[%s894_s5 + $0x68] sm:$0xff]  ;;  %v68_v20 = vld [vmem:[%s894_s5 + $0x30] sm:$0xff] }
  0x10   :  { %555 = vset.pattern.permute.xlu1 %v580_v14  ;;  %554 = vset.pattern.permute.xlu0 %v580_v14  ;;  %v76_v21 = vld [vmem:[%s894_s5 + $0x70] sm:$0xff]  ;;  %v83_v22 = vld [vmem:[%s896_s7 + $0x28] sm:$0xff]  ;;  %v82_v23 = vld [vmem:[%s896_s7 + $0x20] sm:$0xff] }
  0x11   :  { %295 = vperm.xlu1 %555, %v80_v11   ;;  %289 = vperm.xlu0 %554, %v78_v15   ;;  %v69_v24 = vld [vmem:[%s894_s5 + $0x38] sm:$0xff]  ;;  %v84_v27 = vld [vmem:[%s896_s7 + $0x30] sm:$0xff]  ;;  %v87_v28 = vld [vmem:[%s896_s7 + $0x48] sm:$0xff] }
  0x12   :  { %528 = vmatmul.mubr.msk.f32.gmra.mxu0 %vm94_vm0, %v65_v9  ;;  %540 = vmatmul.mubr.msk.f32.gmra.mxu1 %vm94_vm0, %v73_v10  ;;  %v77_v25 = vld [vmem:[%s894_s5 + $0x78] sm:$0xff]  ;;  %v86_v29 = vld [vmem:[%s896_s7 + $0x40] sm:$0xff]  ;;  %v88_v31 = vld [vmem:[%s896_s7 + $0x50] sm:$0xff] }
  0x13   :  { %530 = vmatprep.mubr.msk.f32.mxu0 %vm94_vm0, %v66_v12  ;;  %542 = vmatprep.mubr.msk.f32.mxu1 %vm94_vm0, %v74_v13  ;;  %v85_v26 = vld [vmem:[%s896_s7 + $0x38] sm:$0xff]  ;;  %v91_v32 = vld [vmem:[%s896_s7 + $0x68] sm:$0xff]  ;;  %v90_v33 = vld [vmem:[%s896_s7 + $0x60] sm:$0xff] }
  0x14   :  { %v89_v30 = vld [vmem:[%s896_s7 + $0x58] sm:$0xff]  ;;  %v92_v35 = vld [vmem:[%s896_s7 + $0x70] sm:$0xff]  ;;  %v504_v54 = vld [vmem:[%s895_s6] ss:$0 sm:$0xff] }
  0x15   :  { %298 = vperm.xlu1 %555, %v81_v16   ;;  %292 = vperm.xlu0 %554, %v79_v17   ;;  %v93_v34 = vld [vmem:[%s896_s7 + $0x78] sm:$0xff] }
  0x16   :  { %531 = vmatmul.mubr.msk.f32.gmra.mxu0 %vm94_vm0, %v67_v18  ;;  %543 = vmatmul.mubr.msk.f32.gmra.mxu1 %vm94_vm0, %v75_v19 }
  0x17   :  { %533 = vmatprep.mubr.msk.f32.mxu0 %vm94_vm0, %v68_v20  ;;  %545 = vmatprep.mubr.msk.f32.mxu1 %vm94_vm0, %v76_v21 }
  0x19   :  { %304 = vperm.xlu1 %555, %v83_v22   ;;  %301 = vperm.xlu0 %554, %v82_v23  }
  0x1a   :  { %534 = vmatmul.mubr.msk.f32.gmra.mxu0 %vm94_vm0, %v69_v24  ;;  %546 = vmatmul.mubr.msk.f32.gmra.mxu1 %vm94_vm0, %v77_v25 }
  0x1d   :  { %310 = vperm.xlu1 %555, %v85_v26   ;;  %307 = vperm.xlu0 %554, %v84_v27  }
  0x21   :  { %316 = vperm.xlu1 %555, %v87_v28   ;;  %313 = vperm.xlu0 %554, %v86_v29  }
  0x25   :  { %322 = vperm.xlu1 %555, %v89_v30   ;;  %319 = vperm.xlu0 %554, %v88_v31  }
  0x29   :  { %328 = vperm.xlu1 %555, %v91_v32   ;;  %325 = vperm.xlu0 %554, %v90_v33  }
  0x2d   :  { %334 = vperm.xlu1 %555, %v93_v34   ;;  %331 = vperm.xlu0 %554, %v92_v35  }
  0x8c   :  { %v296_v36 = vpop.permute.xlu1 %295  ;;  %v290_v37 = vpop.permute.xlu0 %289 }
  0x8d   :  { %vm342_vm2 = vcmp.eq.s32.totalorder %v296_v36, %v504_v54  ;;  %vm340_vm3 = vcmp.eq.s32.totalorder %v290_v37, %v504_v54  ;;  %v45_v36 = vlaneseq }
  0x90   :  { %v299_v38 = vpop.permute.xlu1 %298  ;;  %v293_v39 = vpop.permute.xlu0 %292 }
  0x91   :  { %vm343_vm4 = vcmp.eq.s32.totalorder %v299_v38, %v504_v54  ;;  %vm341_vm5 = vcmp.eq.s32.totalorder %v293_v39, %v504_v54  ;;  %v46_v39 = vshrl.u32 %v45_v36, 7 }
  0x94   :  { %v305_v40 = vpop.permute.xlu1 %304  ;;  %v302_v41 = vpop.permute.xlu0 %301 }
  0x95   :  { %vm345_vm1 = vcmp.eq.s32.totalorder %v305_v40, %v504_v54  ;;  %vm344_vm6 = vcmp.eq.s32.totalorder %v302_v41, %v504_v54 }
  0x98   :  { %v311_v42 = vpop.permute.xlu1 %310  ;;  %v308_v43 = vpop.permute.xlu0 %307 }
  0x99   :  { %vm347_vm7 = vcmp.eq.s32.totalorder %v311_v42, %v504_v54  ;;  %vm346_vm8 = vcmp.eq.s32.totalorder %v308_v43, %v504_v54  ;;  %v47_v42 = vadd.s32 8, %v46_v39  ;;  %v48_v43 = vadd.s32 16, %v46_v39 }
  0x9c   :  { %v317_v44 = vpop.permute.xlu1 %316  ;;  %v314_v45 = vpop.permute.xlu0 %313 }
  0x9d   :  { %vm348_vm9 = vcmp.eq.s32.totalorder %v314_v45, %v504_v54  ;;  %vm349_vm10 = vcmp.eq.s32.totalorder %v317_v44, %v504_v54  ;;  %v49_v44 = vadd.s32 24, %v46_v39  ;;  %v50_v45 = vadd.s32 32, %v46_v39 }
  0xa0   :  { %v323_v50 = vpop.permute.xlu1 %322  ;;  %v320_v51 = vpop.permute.xlu0 %319 }
  0xa1   :  { %vm351_vm11 = vcmp.eq.s32.totalorder %v323_v50, %v504_v54  ;;  %vm350_vm12 = vcmp.eq.s32.totalorder %v320_v51, %v504_v54  ;;  %v54_v50 = vadd.s32 64, %v46_v39  ;;  %v55_v51 = vadd.s32 72, %v46_v39 }
  0xa4   :  { %v329_v59 = vpop.permute.xlu1 %328  ;;  %v326_v60 = vpop.permute.xlu0 %325 }
  0xa5   :  { %vm352_vm13 = vcmp.eq.s32.totalorder %v326_v60, %v504_v54  ;;  %vm353_vm14 = vcmp.eq.s32.totalorder %v329_v59, %v504_v54 }
  0xa8   :  { %v335_v14 = vpop.permute.xlu1 %334  ;;  %v332_v15 = vpop.permute.xlu0 %331 }
  0xa9   :  { %vm355_vm15 = vcmp.eq.s32.totalorder %v335_v14, %v504_v54  ;;  %vm354_vm0 = vcmp.eq.s32.totalorder %v332_v15, %v504_v54 }
  0xce   :  { %v526_v46 = vpop.f32.mrf.mxu0  ;;  %v538_v47 = vpop.f32.mrf.mxu1 }
  0xcf   :  { %v759_v0 = vsel %vm341_vm5, %v526_v46, 3e+38  ;;  %v776_v10 = vsel %vm349_vm10, %v538_v47, 3e+38  ;;  %v51_v47 = vadd.s32 40, %v46_v39 }
  0xd0   :  { %v209_v48 = vpop.f32.mrf.mxu0  ;;  %v249_v49 = vpop.f32.mrf.mxu1 }
  0xd1   :  { %v761_v1 = vsel %vm340_vm3, %v209_v48, 3e+38  ;;  %v769_v7 = vsel %vm348_vm9, %v249_v49, 3e+38  ;;  %v52_v48 = vadd.s32 48, %v46_v39  ;;  %v53_v49 = vadd.s32 56, %v46_v39 }
  0xd2   :  { %v529_v52 = vpop.f32.mrf.mxu0  ;;  %v541_v53 = vpop.f32.mrf.mxu1 }
  0xd3   :  { %v772_v8 = vsel %vm343_vm4, %v529_v52, 3e+38  ;;  %v781_v16 = vsel %vm351_vm11, %v541_v53, 3e+38  ;;  %v56_v52 = vadd.s32 80, %v46_v39  ;;  %v57_v53 = vadd.s32 88, %v46_v39 }
  0xd4   :  { %v219_v55 = vpop.f32.mrf.mxu0  ;;  %v259_v56 = vpop.f32.mrf.mxu1 }
  0xd5   :  { %v784_v17 = vsel %vm342_vm2, %v219_v55, 3e+38  ;;  %v793_v23 = vsel %vm350_vm12, %v259_v56, 3e+38  ;;  %v58_v55 = vadd.s32 96, %v46_v39  ;;  %v59_v56 = vadd.s32 104, %v46_v39 }
  0xd6   :  { %v532_v57 = vpop.f32.mrf.mxu0  ;;  %v544_v58 = vpop.f32.mrf.mxu1 }
  0xd7   :  { %v757_v61 = vsel %vm345_vm1, %v532_v57, 3e+38  ;;  %v369_v27 = vsel %vm353_vm14, %v544_v58, 3e+38  ;;  %v60_v57 = vadd.s32 112, %v46_v39  ;;  %v61_v58 = vadd.s32 120, %v46_v39 }
  0xd8   :  { %v229_v62 = vpop.f32.mrf.mxu0  ;;  %v269_v63 = vpop.f32.mrf.mxu1  ;;  %v373_v3 = vmin.f32 %v759_v0, %v757_v61 }
  0xd9   :  { %v763_v2 = vsel %vm344_vm6, %v229_v62, 3e+38  ;;  %v795_v24 = vsel %vm352_vm13, %v269_v63, 3e+38 }
  0xda   :  { %v372_v4 = vmin.f32 %v761_v1, %v763_v2  ;;  %v535_v5 = vpop.f32.mrf.mxu0  ;;  %v547_v6 = vpop.f32.mrf.mxu1  ;;  %v377_v19 = vmin.f32 %v373_v3, %v776_v10 }
  0xdb   :  { %v774_v9 = vsel %vm347_vm7, %v535_v5, 3e+38  ;;  %v799_v28 = vsel %vm355_vm15, %v547_v6, 3e+38 }
  0xdc   :  { %v376_v11 = vmin.f32 %v372_v4, %v769_v7  ;;  %v375_v12 = vmin.f32 %v772_v8, %v774_v9  ;;  %v239_v13 = vpop.f32.mrf.mxu0  ;;  %v279_v22 = vpop.f32.mrf.mxu1  ;;  %v381_v30 = vmin.f32 %v377_v19, %v369_v27  ;;  %v466_v19 = vld [vmem:[#allocation2] sm:$0x1] }
  0xdd   :  { %v787_v18 = vsel %vm346_vm8, %v239_v13, 3e+38  ;;  %v370_v29 = vsel %vm354_vm0, %v279_v22, 3e+38 }
  0xde   :  { %v379_v20 = vmin.f32 %v375_v12, %v781_v16  ;;  %v374_v21 = vmin.f32 %v784_v17, %v787_v18  ;;  %v380_v25 = vmin.f32 %v376_v11, %v795_v24 }
  0xe0   :  { %v378_v26 = vmin.f32 %v374_v21, %v793_v23  ;;  %v383_v31 = vmin.f32 %v379_v20, %v799_v28  ;;  %v384_v33 = vmin.f32 %v380_v25, %v381_v30  ;;  %v471_v20 = vld [vmem:[#allocation2] sm:$0x1] }
  0xe2   :  { %v382_v32 = vmin.f32 %v378_v26, %v370_v29 }
  0xe4   :  { %v385_v34 = vmin.f32 %v382_v32, %v383_v31 }
  0xe6   :  { %v386_v35 = vmin.f32 %v384_v33, %v385_v34  ;;  %v468_v34 = vld [vmem:[#allocation8] sm:$0x1] }
  0xe8   :  { %v387_v37 = vrot.slane %v386_v35, 4 }
  0xea   :  { %v388_v38 = vmin.f32 %v386_v35, %v387_v37 }
  0xec   :  { %v389_v40 = vrot.slane %v388_v38, 2 }
  0xee   :  { %v390_v41 = vmin.f32 %v388_v38, %v389_v40 }
  0xf0   :  { %v391_v46 = vrot.slane %v390_v41, 1 }
  0xf2   :  { %v802_v54 = vmin.f32 %v390_v41, %v391_v46 }
  0xf4   :  { %vm393_vm1 = vcmp.eq.f32.partialorder %v761_v1, %v802_v54  ;;  %vm394_vm2 = vcmp.eq.f32.partialorder %v759_v0, %v802_v54  ;;  %vm395_vm3 = vcmp.eq.f32.partialorder %v784_v17, %v802_v54  ;;  %vm396_vm4 = vcmp.eq.f32.partialorder %v772_v8, %v802_v54 }
  0xf5   :  { %vm397_vm5 = vcmp.eq.f32.partialorder %v763_v2, %v802_v54  ;;  %vm398_vm6 = vcmp.eq.f32.partialorder %v757_v61, %v802_v54  ;;  %vm399_vm7 = vcmp.eq.f32.partialorder %v787_v18, %v802_v54  ;;  %vm400_vm8 = vcmp.eq.f32.partialorder %v774_v9, %v802_v54 }
  0xf6   :  { %vm401_vm9 = vcmp.eq.f32.partialorder %v769_v7, %v802_v54  ;;  %vm402_vm10 = vcmp.eq.f32.partialorder %v776_v10, %v802_v54  ;;  %vm403_vm11 = vcmp.eq.f32.partialorder %v793_v23, %v802_v54  ;;  %vm404_vm12 = vcmp.eq.f32.partialorder %v781_v16, %v802_v54 }
  0xf7   :  { %vm405_vm13 = vcmp.eq.f32.partialorder %v795_v24, %v802_v54  ;;  %vm406_vm14 = vcmp.eq.f32.partialorder %v369_v27, %v802_v54  ;;  %vm407_vm15 = vcmp.eq.f32.partialorder %v370_v29, %v802_v54  ;;  %vm408_vm0 = vcmp.eq.f32.partialorder %v799_v28, %v802_v54 }
  0xf8   :  { %v409_v59 = vsel %vm393_vm1, %v46_v39, 128  ;;  %v410_v60 = vsel %vm394_vm2, %v47_v42, 128  ;;  %v411_v62 = vsel %vm395_vm3, %v48_v43, 128  ;;  %v412_v63 = vsel %vm396_vm4, %v49_v44, 128 }
  0xf9   :  { %v413_v3 = vsel %vm397_vm5, %v50_v45, 128  ;;  %v414_v1 = vsel %vm398_vm6, %v51_v47, 128  ;;  %v415_v0 = vsel %vm399_vm7, %v52_v48, 128  ;;  %v416_v4 = vsel %vm400_vm8, %v53_v49, 128 }
  0xfa   :  { %v417_v5 = vsel %vm401_vm9, %v54_v50, 128  ;;  %v418_v2 = vsel %vm402_vm10, %v55_v51, 128  ;;  %v419_v61 = vsel %vm403_vm11, %v56_v52, 128  ;;  %v420_v6 = vsel %vm404_vm12, %v57_v53, 128 }
  0xfb   :  { %v421_v8 = vsel %vm405_vm13, %v58_v55, 128  ;;  %v422_v7 = vsel %vm406_vm14, %v59_v56, 128  ;;  %v423_v9 = vsel %vm407_vm15, %v60_v57, 128  ;;  %v424_v10 = vsel %vm408_vm0, %v61_v58, 128 }
  0xfc   :  { %vm425_vm1 = vcmp.lt.s32.totalorder %v409_v59, %v413_v3  ;;  %vm427_vm2 = vcmp.lt.s32.totalorder %v410_v60, %v414_v1  ;;  %vm429_vm3 = vcmp.lt.s32.totalorder %v411_v62, %v415_v0  ;;  %vm431_vm4 = vcmp.lt.s32.totalorder %v412_v63, %v416_v4 }
  0xfd   :  { %v426_v11 = vsel %vm425_vm1, %v409_v59, %v413_v3  ;;  %v428_v12 = vsel %vm427_vm2, %v410_v60, %v414_v1  ;;  %v430_v13 = vsel %vm429_vm3, %v411_v62, %v415_v0  ;;  %v432_v14 = vsel %vm431_vm4, %v412_v63, %v416_v4 }
  0xfe   :  { %vm433_vm5 = vcmp.lt.s32.totalorder %v426_v11, %v417_v5  ;;  %vm435_vm6 = vcmp.lt.s32.totalorder %v428_v12, %v418_v2  ;;  %vm437_vm7 = vcmp.lt.s32.totalorder %v430_v13, %v419_v61  ;;  %vm439_vm8 = vcmp.lt.s32.totalorder %v432_v14, %v420_v6 }
  0xff   :  { %v434_v15 = vsel %vm433_vm5, %v426_v11, %v417_v5  ;;  %v436_v16 = vsel %vm435_vm6, %v428_v12, %v418_v2  ;;  %v438_v17 = vsel %vm437_vm7, %v430_v13, %v419_v61  ;;  %v440_v18 = vsel %vm439_vm8, %v432_v14, %v420_v6 }
 0x100   :  { %vm441_vm9 = vcmp.lt.s32.totalorder %v434_v15, %v421_v8  ;;  %vm443_vm10 = vcmp.lt.s32.totalorder %v436_v16, %v422_v7  ;;  %vm445_vm11 = vcmp.lt.s32.totalorder %v438_v17, %v423_v9  ;;  %vm447_vm12 = vcmp.lt.s32.totalorder %v440_v18, %v424_v10 }
 0x101   :  { %v442_v21 = vsel %vm441_vm9, %v434_v15, %v421_v8  ;;  %v444_v22 = vsel %vm443_vm10, %v436_v16, %v422_v7  ;;  %v446_v23 = vsel %vm445_vm11, %v438_v17, %v423_v9  ;;  %v448_v24 = vsel %vm447_vm12, %v440_v18, %v424_v10 }
 0x102   :  { %vm449_vm13 = vcmp.lt.s32.totalorder %v442_v21, %v444_v22  ;;  %vm451_vm14 = vcmp.lt.s32.totalorder %v446_v23, %v448_v24  ;;  %vm467_vm15 = vcmp.lt.f32.partialorder %v802_v54, %v466_v19 }
 0x103   :  { %v450_v25 = vsel %vm449_vm13, %v442_v21, %v444_v22  ;;  %v452_v26 = vsel %vm451_vm14, %v446_v23, %v448_v24  ;;  %v472_v27 = vsel %vm467_vm15, %v802_v54, %v471_v20 }
 0x104   :  { %vm453_vm0 = vcmp.lt.s32.totalorder %v450_v25, %v452_v26  ;;  %473 = vst [vmem:[#allocation2] sm:$0x1] %v472_v27 }
 0x105   :  { %v454_v28 = vsel %vm453_vm0, %v450_v25, %v452_v26 }
 0x106   :  { %v455_v29 = vrot.slane %v454_v28, 4 }
 0x108   :  { %vm456_vm1 = vcmp.lt.s32.totalorder %v454_v28, %v455_v29 }
 0x109   :  { %v457_v30 = vsel %vm456_vm1, %v454_v28, %v455_v29 }
 0x10a   :  { %v458_v31 = vrot.slane %v457_v30, 2 }
 0x10c   :  { %vm459_vm2 = vcmp.lt.s32.totalorder %v457_v30, %v458_v31 }
 0x10d   :  { %v460_v32 = vsel %vm459_vm2, %v457_v30, %v458_v31 }
 0x10e   :  { %v461_v33 = vrot.slane %v460_v32, 1 }
 0x110   :  { %vm462_vm3 = vcmp.lt.s32.totalorder %v460_v32, %v461_v33 }
 0x111   :  { %v463_v35 = vsel %vm462_vm3, %v460_v32, %v461_v33 }
 0x112   :  { %v469_v36 = vsel %vm467_vm15, %v463_v35, %v468_v34 }
 0x113   :  { %470 = vst [vmem:[#allocation8] sm:$0x1] %v469_v36 }
 0x114 PF:  { %s581_s6 = smov [#allocation8]  }
 0x115   :  { %s480_s20 = sshll.u32 %s581_s6, 4  ;;  %s481_s20 = int_to_ptr.vmem [resolvable:$true] %s480_s20 }
 0x116   :  { %s556_s21 = scalar_lea.vmem %s481_s20, 16  ;;  %s560_s22 = scalar_lea.vmem %s481_s20, 32 }
 0x117   :  { %p557_p3 = scmp.ne.s32.totalorder %s481_s20, %s556_s21  ;;  %p561_p4 = scmp.lt.s32.totalorder %s481_s20, %s481_s20 }
 0x118   :  { %p562_p5 = scmp.lt.s32.totalorder %s560_s22, %s556_s21 }
 0x11a   :  { %p563_p6 = por %p562_p5, %p561_p4 }
 0x11c   :  { %p564_p7 = pnand %p563_p6, %p557_p3 }
 0x11e   :  { %567 = shalt.err (!%p564_p7)
}
 0x11f   :  { %483 = dma.vmem_to_hbm [thread:$0]  %s481_s20, 16, %s897_s8, [#allocation9]  }
 0x120   :  { %576 = dma.done.wait [#allocation9], 16  }
 0x121   :  { %577 = vsyncadd [#allocation9], 4294967280 }
 0x122   :  { %487 = vsyncpa [#allocation9], 1 }

</bundles_post_ra>
